<compile_context>
chip_gen: v7x
topology: tpu7x:2x2x1
jax: 0.10.0
libtpu: 0.0.40
codegen_flags: <defaults>
</compile_context>

<pallas_src>
import functools

import jax
import jax.numpy as jnp
import numpy as np
from jax import lax
from jax.experimental import pallas as pl
from jax.experimental.pallas import tpu as pltpu

EPS = 1e-5
VMEM_LIMIT = 32 * 1024 * 1024      # conservative; safe on v7x's 64 MiB VMEM


def _spatial_tile(hw, max_lanes=8192):
    """Largest multiple-of-128 divisor of hw that is <= max_lanes (else full hw)."""
    best = None
    t = 128
    while t <= min(hw, max_lanes):
        if hw % t == 0:
            best = t
        t += 128
    return best if best is not None else hw


def bn2_stats_kernel(x_ref, scale1_ref, shift1_ref, w1_ref, sum_ref, sq_ref):
    """Per-block partial BN2 stats of y1 = w1 @ relu(bn1(x)).  y1 stays in VMEM.

    x_ref: (1, C_in, Lt) NCHW slab (spatial in lanes)
    scale1/shift1: (C_in, 1) folded BN1 params ; w1_ref: (C_mid, C_in)
    sum_ref/sq_ref: (1, 1, C_mid) lane-dense partial stats
    """
    a = jnp.maximum(x_ref[0] * scale1_ref[...] + shift1_ref[...], 0.0)
    y = jnp.dot(w1_ref[...], a, preferred_element_type=jnp.float32)   # (C_mid, Lt)
    sum_ref[...] = jnp.sum(y, axis=1).reshape(1, 1, -1)
    sq_ref[...] = jnp.sum(y * y, axis=1).reshape(1, 1, -1)


def dense_layer_kernel(x_ref, scale1_ref, shift1_ref, w1_ref,
                       scale2_ref, shift2_ref, w2_ref, o_ref, *, H, W):
    """Fused BN1+ReLU+1x1conv (recompute) + BN2+ReLU+3x3conv + channel concat.

    x_ref : (NB, C_in, HW)    scale1/shift1 : (C_in, 1)    w1_ref : (C_mid, C_in)
    scale2/shift2 : (C_mid, 1)    w2_ref : (9, G, C_mid)
    o_ref : (NB, C_in + G, HW) final NCHW output block
    """
    NB, C_in, HW = x_ref.shape
    G = w2_ref.shape[1]

    # Per-lane boundary masks for the nine taps (shared across images in block).
    lane = lax.broadcasted_iota(jnp.int32, (1, HW), 1)
    h_idx = lane // W
    w_idx = lane % W
    valid_masks = []
    for kh in range(3):
        for kw in range(3):
            src_h = h_idx + (kh - 1)
            src_w = w_idx + (kw - 1)
            valid = (src_h >= 0) & (src_h < H) & (src_w >= 0) & (src_w < W)
            valid_masks.append(valid.astype(jnp.float32))

    for i in range(NB):
        x_i = x_ref[i]                                                # (C_in, HW)
        # Recompute y1 (cheap K=C_in matmul) instead of reading it from HBM.
        a1 = jnp.maximum(x_i * scale1_ref[...] + shift1_ref[...], 0.0)
        y1 = jnp.dot(w1_ref[...], a1, preferred_element_type=jnp.float32)
        a2 = jnp.maximum(y1 * scale2_ref[...] + shift2_ref[...], 0.0)  # (C_mid, HW)

        acc = jnp.zeros((G, HW), jnp.float32)
        for kh in range(3):
            for kw in range(3):
                d = (kh - 1) * W + (kw - 1)
                # shifted[p] == a2[p + d]; wrap / out-of-image lanes are zeroed
                # by the per-lane mask (applied post-matmul — exactly equal).
                shifted = a2 if d == 0 else pltpu.roll(a2, (-d) % HW, axis=1)
                tap = jnp.dot(w2_ref[kh * 3 + kw], shifted,
                              preferred_element_type=jnp.float32)     # (G, HW)
                acc = acc + tap * valid_masks[kh * 3 + kw]

        # Fused concat: one full-tile (C_in+G, HW) store per image.
        o_ref[i] = jnp.concatenate([x_i, acc], axis=0).astype(o_ref.dtype)


def dense_layer_forward(x_nchw, params):
    """Pallas implementation of DenseLayer.forward.  x_nchw: (N, C_in, H, W)."""
    g1, b1, w1, g2, b2, w2 = params        # w1: (C_mid, C_in, 1, 1), w2: (G, C_mid, 3, 3)
    N, C_in, H, W = x_nchw.shape
    C_mid = w1.shape[0]
    G = w2.shape[0]
    HW = H * W
    M = N * HW

    x3 = x_nchw.reshape(N, C_in, HW).astype(jnp.float32)   # NCHW, spatial flattened

    # ---- BN1 (training-mode batch stats) in one fused XLA pass over x.
    mean1 = jnp.mean(x3, axis=(0, 2))
    ex2_1 = jnp.mean(x3 * x3, axis=(0, 2))
    var1 = jnp.maximum(ex2_1 - mean1 * mean1, 0.0)
    scale1 = (g1 / jnp.sqrt(var1 + EPS)).reshape(C_in, 1)
    shift1 = b1.reshape(C_in, 1) - mean1.reshape(C_in, 1) * scale1

    w1_mat = w1[:, :, 0, 0]                                   # (C_mid, C_in)
    w2_t = jnp.transpose(w2, (2, 3, 0, 1)).reshape(9, G, C_mid)

    # ---- Kernel 1: per-block BN2 partial stats only (y1 never hits HBM).
    Lt = _spatial_tile(HW)
    nbhw = HW // Lt
    nblk = N * nbhw
    ps, pq = pl.pallas_call(
        bn2_stats_kernel,
        out_shape=(
            jax.ShapeDtypeStruct((nblk, 1, C_mid), jnp.float32),
            jax.ShapeDtypeStruct((nblk, 1, C_mid), jnp.float32),
        ),
        grid=(N, nbhw),
        in_specs=[
            pl.BlockSpec((1, C_in, Lt), lambda n, j: (n, 0, j)),
            pl.BlockSpec((C_in, 1), lambda n, j: (0, 0)),
            pl.BlockSpec((C_in, 1), lambda n, j: (0, 0)),
            pl.BlockSpec((C_mid, C_in), lambda n, j: (0, 0)),
        ],
        out_specs=(
            pl.BlockSpec((1, 1, C_mid), lambda n, j: (n * nbhw + j, 0, 0)),
            pl.BlockSpec((1, 1, C_mid), lambda n, j: (n * nbhw + j, 0, 0)),
        ),
        compiler_params=pltpu.CompilerParams(
            dimension_semantics=("parallel", "parallel"),
            vmem_limit_bytes=VMEM_LIMIT),
    )(x3, scale1, shift1, w1_mat)

    # ---- BN2 stats finalized from tiny per-block partials.
    tot_sum = jnp.sum(ps[:, 0, :], axis=0)
    tot_sq = jnp.sum(pq[:, 0, :], axis=0)
    mean2 = tot_sum / M
    var2 = jnp.maximum(tot_sq / M - mean2 * mean2, 0.0)
    scale2 = (g2 / jnp.sqrt(var2 + EPS)).reshape(C_mid, 1)
    shift2 = b2.reshape(C_mid, 1) - mean2.reshape(C_mid, 1) * scale2

    # ---- Kernel 2: fused recompute + BN2 + ReLU + 3x3 conv + concat.
    # Pick NB images / step under a lane budget, but keep >= 2 grid steps when
    # N >= 2 so both v7x TensorCores stay busy and the pipeline double-buffers.
    NB = 1
    for cand in range(1, N + 1):
        if N % cand != 0:
            continue
        if cand * HW > 4096:
            continue
        if N >= 2 and N // cand < 2:
            continue
        NB = cand

    out = pl.pallas_call(
        functools.partial(dense_layer_kernel, H=H, W=W),
        out_shape=jax.ShapeDtypeStruct((N, C_in + G, HW), jnp.float32),
        grid=(N // NB,),
        in_specs=[
            pl.BlockSpec((NB, C_in, HW), lambda b: (b, 0, 0)),
            pl.BlockSpec((C_in, 1), lambda b: (0, 0)),
            pl.BlockSpec((C_in, 1), lambda b: (0, 0)),
            pl.BlockSpec((C_mid, C_in), lambda b: (0, 0)),
            pl.BlockSpec((C_mid, 1), lambda b: (0, 0)),
            pl.BlockSpec((C_mid, 1), lambda b: (0, 0)),
            pl.BlockSpec((9, G, C_mid), lambda b: (0, 0, 0)),
        ],
        out_specs=pl.BlockSpec((NB, C_in + G, HW), lambda b: (b, 0, 0)),
        compiler_params=pltpu.CompilerParams(
            dimension_semantics=("parallel",),
            vmem_limit_bytes=VMEM_LIMIT),
    )(x3, scale1, shift1, w1_mat, scale2, shift2, w2_t)

    return out.reshape(N, C_in + G, H, W)


def ref_forward(x, params):
    """Pure-JAX reference matching the PyTorch forward (training-mode BN)."""
    g1, b1, w1, g2, b2, w2 = params
    mean1 = x.mean((0, 2, 3), keepdims=True)
    var1 = ((x - mean1) ** 2).mean((0, 2, 3), keepdims=True)
    y = (x - mean1) / jnp.sqrt(var1 + EPS) * g1[None, :, None, None] + b1[None, :, None, None]
    y = jnp.maximum(y, 0.0)
    y = lax.conv_general_dilated(y, w1, (1, 1), 'VALID',
                                 dimension_numbers=('NCHW', 'OIHW', 'NCHW'))
    mean2 = y.mean((0, 2, 3), keepdims=True)
    var2 = ((y - mean2) ** 2).mean((0, 2, 3), keepdims=True)
    y = (y - mean2) / jnp.sqrt(var2 + EPS) * g2[None, :, None, None] + b2[None, :, None, None]
    y = jnp.maximum(y, 0.0)
    y = lax.conv_general_dilated(y, w2, (1, 1), ((1, 1), (1, 1)),
                                 dimension_numbers=('NCHW', 'OIHW', 'NCHW'))
    return jnp.concatenate([x, y], axis=1)


if __name__ == "__main__":
    # DenseLayer(inp_chl=4, growth_rate=8, bn_size=4)
    inp_chl, growth_rate, bn_size = 4, 8, 4
    C_mid = bn_size * growth_rate          # 32
    N, H, W = 2, 16, 16

    key = jax.random.PRNGKey(0)
    kx, kw1, kw2 = jax.random.split(key, 3)

    x = jax.random.normal(kx, (N, inp_chl, H, W), dtype=jnp.float32)

    # PyTorch BatchNorm2d defaults: gamma=1, beta=0; conv weights deterministic.
    gamma1 = jnp.ones((inp_chl,), jnp.float32)
    beta1 = jnp.zeros((inp_chl,), jnp.float32)
    w1 = 0.1 * jax.random.normal(kw1, (C_mid, inp_chl, 1, 1), dtype=jnp.float32)
    gamma2 = jnp.ones((C_mid,), jnp.float32)
    beta2 = jnp.zeros((C_mid,), jnp.float32)
    w2 = 0.1 * jax.random.normal(kw2, (growth_rate, C_mid, 3, 3), dtype=jnp.float32)

    params = (gamma1, beta1, w1, gamma2, beta2, w2)

    out = jax.block_until_ready(dense_layer_forward(x, params))
    assert out.shape == (N, inp_chl + growth_rate, H, W), out.shape

    ref = jax.block_until_ready(ref_forward(x, params))
    np.testing.assert_allclose(np.asarray(out), np.asarray(ref), atol=2e-3, rtol=2e-3)

    print("KERNEL_OK")
</pallas_src>

<mosaic_0001>
module attributes {stable_mosaic.version = 11 : i64} {
  func.func @bn2_stats_kernel(%arg0: i32, %arg1: i32, %arg2: memref<1x4x256xf32, #tpu.memory_space<vmem>>, %arg3: memref<4x1xf32, #tpu.memory_space<vmem>>, %arg4: memref<4x1xf32, #tpu.memory_space<vmem>>, %arg5: memref<32x4xf32, #tpu.memory_space<vmem>>, %arg6: memref<1x1x32xf32, #tpu.memory_space<vmem>>, %arg7: memref<1x1x32xf32, #tpu.memory_space<vmem>>) attributes {dimension_semantics = [#tpu.dimension_semantics<parallel>, #tpu.dimension_semantics<parallel>], iteration_bounds = array<i64: 2, 1>, scalar_prefetch = 0 : i64, scratch_operands = 0 : i64, tpu.core_type = #tpu.core_type<tc>, window_params = [{transform_indices = @transform_0, window_bounds = array<i64: 1, 4, 256>}, {pipeline_mode = #tpu.pipeline_mode<synchronous>, transform_indices = @transform_1, window_bounds = array<i64: 4, 1>}, {pipeline_mode = #tpu.pipeline_mode<synchronous>, transform_indices = @transform_2, window_bounds = array<i64: 4, 1>}, {pipeline_mode = #tpu.pipeline_mode<synchronous>, transform_indices = @transform_3, window_bounds = array<i64: 32, 4>}, {transform_indices = @transform_4, window_bounds = array<i64: 1, 1, 32>}, {transform_indices = @transform_5, window_bounds = array<i64: 1, 1, 32>}]} {
    %c0 = arith.constant 0 : index
    %c0_0 = arith.constant 0 : index
    %c0_1 = arith.constant 0 : index
    %0 = vector.load %arg2[%c0, %c0_0, %c0_1] : memref<1x4x256xf32, #tpu.memory_space<vmem>>, vector<1x4x256xf32>
    %1 = vector.shape_cast %0 : vector<1x4x256xf32> to vector<4x256xf32>
    %c0_2 = arith.constant 0 : index
    %c0_3 = arith.constant 0 : index
    %2 = vector.load %arg3[%c0_2, %c0_3] : memref<4x1xf32, #tpu.memory_space<vmem>>, vector<4x1xf32>
    %3 = vector.broadcast %2 : vector<4x1xf32> to vector<4x256xf32>
    %4 = arith.mulf %1, %3 : vector<4x256xf32>
    %c0_4 = arith.constant 0 : index
    %c0_5 = arith.constant 0 : index
    %5 = vector.load %arg4[%c0_4, %c0_5] : memref<4x1xf32, #tpu.memory_space<vmem>>, vector<4x1xf32>
    %6 = vector.broadcast %5 : vector<4x1xf32> to vector<4x256xf32>
    %7 = arith.addf %4, %6 : vector<4x256xf32>
    %cst = arith.constant 0.000000e+00 : f32
    %8 = vector.broadcast %cst : f32 to vector<4x256xf32>
    %9 = arith.maximumf %7, %8 : vector<4x256xf32>
    %c0_6 = arith.constant 0 : index
    %c0_7 = arith.constant 0 : index
    %10 = vector.load %arg5[%c0_6, %c0_7] : memref<32x4xf32, #tpu.memory_space<vmem>>, vector<32x4xf32>
    %cst_8 = arith.constant dense<0.000000e+00> : vector<32x256xf32>
    %11 = tpu.matmul %10, %9, %cst_8 {dimension_numbers = #tpu.dot_dimension_numbers<[1], [0], [0], [1], [0, 0, 1, 1], [], []>} : vector<32x4xf32>, vector<4x256xf32>, vector<32x256xf32> -> vector<32x256xf32>
    %cst_9 = arith.constant dense<0.000000e+00> : vector<32xf32>
    %12 = vector.multi_reduction <add>, %11, %cst_9 [1] : vector<32x256xf32> to vector<32xf32>
    %13 = vector.shape_cast %12 : vector<32xf32> to vector<1x1x32xf32>
    %c0_10 = arith.constant 0 : index
    %c0_11 = arith.constant 0 : index
    %c0_12 = arith.constant 0 : index
    %14 = vector.load %arg6[%c0_10, %c0_11, %c0_12] : memref<1x1x32xf32, #tpu.memory_space<vmem>>, vector<1x1x32xf32>
    tpu.vector_store %arg6[%c0_10, %c0_11, %c0_12], %13 {strides = array<i32>} : memref<1x1x32xf32, #tpu.memory_space<vmem>>, vector<1x1x32xf32>,
    %15 = arith.mulf %11, %11 : vector<32x256xf32>
    %cst_13 = arith.constant dense<0.000000e+00> : vector<32xf32>
    %16 = vector.multi_reduction <add>, %15, %cst_13 [1] : vector<32x256xf32> to vector<32xf32>
    %17 = vector.shape_cast %16 : vector<32xf32> to vector<1x1x32xf32>
    %c0_14 = arith.constant 0 : index
    %c0_15 = arith.constant 0 : index
    %c0_16 = arith.constant 0 : index
    %18 = vector.load %arg7[%c0_14, %c0_15, %c0_16] : memref<1x1x32xf32, #tpu.memory_space<vmem>>, vector<1x1x32xf32>
    tpu.vector_store %arg7[%c0_14, %c0_15, %c0_16], %17 {strides = array<i32>} : memref<1x1x32xf32, #tpu.memory_space<vmem>>, vector<1x1x32xf32>,
    return
  }
  func.func @transform_0(%arg0: i32, %arg1: i32) -> (i32, i32, i32) {
    %c0_i32 = arith.constant 0 : i32
    %c0_i32_0 = arith.constant 0 : i32
    return %arg0, %c0_i32, %arg1 : i32, i32, i32
  }
  func.func @transform_1(%arg0: i32, %arg1: i32) -> (i32, i32) {
    %c0_i32 = arith.constant 0 : i32
    %c0_i32_0 = arith.constant 0 : i32
    %c0_i32_1 = arith.constant 0 : i32
    return %c0_i32, %c0_i32_0 : i32, i32
  }
  func.func @transform_2(%arg0: i32, %arg1: i32) -> (i32, i32) {
    %c0_i32 = arith.constant 0 : i32
    %c0_i32_0 = arith.constant 0 : i32
    %c0_i32_1 = arith.constant 0 : i32
    return %c0_i32, %c0_i32_0 : i32, i32
  }
  func.func @transform_3(%arg0: i32, %arg1: i32) -> (i32, i32) {
    %c0_i32 = arith.constant 0 : i32
    %c0_i32_0 = arith.constant 0 : i32
    %c0_i32_1 = arith.constant 0 : i32
    return %c0_i32, %c0_i32_0 : i32, i32
  }
  func.func @transform_4(%arg0: i32, %arg1: i32) -> (i32, i32, i32) {
    %c1_i32 = arith.constant 1 : i32
    %0 = arith.muli %arg0, %c1_i32 : i32
    %1 = arith.addi %0, %arg1 : i32
    %c0_i32 = arith.constant 0 : i32
    %c0_i32_0 = arith.constant 0 : i32
    %c0_i32_1 = arith.constant 0 : i32
    return %1, %c0_i32, %c0_i32_0 : i32, i32, i32
  }
  func.func @transform_5(%arg0: i32, %arg1: i32) -> (i32, i32, i32) {
    %c1_i32 = arith.constant 1 : i32
    %0 = arith.muli %arg0, %c1_i32 : i32
    %1 = arith.addi %0, %arg1 : i32
    %c0_i32 = arith.constant 0 : i32
    %c0_i32_0 = arith.constant 0 : i32
    %c0_i32_1 = arith.constant 0 : i32
    return %1, %c0_i32, %c0_i32_0 : i32, i32, i32
  }
}

</mosaic_0001>

<bundles_post_ra>
// kernel: tpu_custom_call.1
= control target key start
LH: loop header
LB: loop body
LE: loop exit
PB: predicated region body
PF: predicated region fallthrough
CT: control target
= control target key end

     0   :  { %11 = vsyncpa [#allocation3], 0  ;;  %s1050_s0 = inlined_call_operand.vmem [shape: f32[2,4,256], index: 0, kind: input, shape index: {}]   ;;  %s1051_s1 = inlined_call_operand.vmem [shape: f32[4,1], index: 1, kind: input, shape index: {}]   ;;  %s1052_s2 = inlined_call_operand.vmem [shape: f32[4,1], index: 2, kind: input, shape index: {}]   ;;  %s1053_s3 = inlined_call_operand.vmem [shape: f32[32,4], index: 3, kind: input, shape index: {}]   ;;  %s1054_s4 = inlined_call_operand.hbm [shape: f32[2,1,32], index: 4, kind: output, shape index: {0}]   ;;  %s1055_s5 = inlined_call_operand.hbm [shape: f32[2,1,32], index: 5, kind: output, shape index: {1}]  }
   0x1   :  { %13 = vsyncpa [#allocation3 + $0x1], 0 }
   0x2   :  { %14 = vsyncpa [#allocation5], 0 }
   0x3   :  { %16 = vsyncpa [#allocation5 + $0x1], 0  ;;  %s862_s18 = smov 0   ;;  %s864_s19 = smov 0  }
   0x4   :  { %s866_s20 = smov 0   ;;  %s868_s21 = smov 0  }
   0x5   :  { %s870_s22 = smov 0   ;;  %s872_s23 = smov 0  }
   0x6 LB: > { %s631_s24 = sadd.s32 4294967295, %s825_s23   ;;  %s632_s25 = sadd.s32 4294967294, %s825_s23   ;;  %s825_s23 = sphi %s872_s23, %s22_s23   ;;  %s821_s22 = sphi %s870_s22, %s1062_s22   ;;  %s817_s21 = sphi %s868_s21, %s1061_s21   ;;  %s813_s20 = sphi %s866_s20, %s1060_s20   ;;  %s809_s19 = sphi %s864_s19, %s1059_s19   ;;  %s805_s18 = sphi %s862_s18, %s1058_s18  }
   0x7   : > { %s34_s26 = sadd.s32 1, %s821_s22  ;;  %s134_s27 = sadd.s32 1, %s813_s20 }
   0x8   : > { %p36_p0 = scmp.ge.s32.totalorder %s34_s26, 2  ;;  %p144_p1 = scmp.ne.s32.totalorder %s813_s20, %s809_s19 }
   0x9   : > { %p145_p2 = scmp.eq.s32.totalorder %s631_s24, 1  ;;  %p150_p3 = scmp.ne.s32.totalorder %s809_s19, %s805_s18 }
   0xa   : > { %s1064_s26 = smov (%p36_p0, %s34_s26), 0  ;;  %p151_p5 = scmp.eq.s32.totalorder %s632_s25, 1 }
   0xb   : > { %p902_p4 = por %p145_p2, %p144_p1  ;;  %s131_s29 = ssub.s32 %s821_s22, %s1064_s26 }
   0xc   : > { %p635_p6 = scmp.ge.s32.totalorder %s825_s23, 1  ;;  %p132_p7 = scmp.eq.s32.totalorder %s131_s29, 0 }
   0xd   : > { %p909_p8 = por %p151_p5, %p150_p3  ;;  %p219_p9 = scmp.lt.s32.totalorder %s825_s23, 3 }
   0xe   : > { %s915_s6 = scalar_select %p132_p7, %s813_s20, %s134_s27  }
   0xf   : > { %p220_p10 = pnand %p635_p6, %p219_p9 }
  0x10   : > { %v267_v0 = vld [vmem:[%s1051_s1] sm:$0xf] (!%p220_p10)  ;;  %v827_v1 = vmov (!%p220_p10), 0   ;;  %v828_v3 = vmov (!%p220_p10), 0.0   ;;  %p255_p11 = scmp.lt.s32.totalorder (!%p220_p10), %s817_s21, 1  ;;  %v275_v6 = vlaneseq (!%p220_p10)  ;;  %vm315_vm0 = vcmask (!%p220_p10), 1043456  }
  0x11   : > { %223 = sbr.rel (%p220_p10) target bundleno = 575 (0x23f), region = 36  ;;  %714 = vset.pattern.permute.xlu0 (!%p220_p10), %v827_v1  ;;  %v281_v2 = vld [vmem:[%s1052_s2] sm:$0xf] (!%p220_p10)  ;;  %384 = vmatprep.mubr.f32.mxu0 (!%p220_p10), %v828_v3  ;;  %v829_v4 = vmov (!%p220_p10), 839922192   ;;  %vm302_vm1 = vcmask (!%p220_p10), 31744  }
  0x12   : > { %270 = vperm.xlu0 (!%p220_p10), %714, %v267_v0   ;;  %396 = vmatprep.mubr.f32.mxu1 (!%p220_p10), %v828_v3  ;;  %v273_v5 = vunpack.c.l.s4 (!%p220_p10), %v829_v4  ;;  %v926_v8 = vshrl.u32 (!%p220_p10), %v275_v6, 7  ;;  %v296_v19 = vld [vmem:[%s1053_s3] sm:$0xff] (!%p220_p10)  ;;  %v298_v20 = vld [vmem:[%s1053_s3 + $0x10] sm:$0xff] (!%p220_p10)  ;;  %v297_v21 = vld [vmem:[%s1053_s3 + $0x8] sm:$0xff] (!%p220_p10)  ;;  %v426_v48 = vand.u32 (!%p220_p10), 127, %v275_v6  ;;  %s950_s9 = sand.u32 (!%p220_p10), 1, %s809_s19  }
  0x13   : > { %v299_v22 = vld [vmem:[%s1053_s3 + $0x18] sm:$0xff] (!%p220_p10)  ;;  %vm436_vm2 = vcmask (!%p220_p10), 130112   ;;  %vm443_vm3 = vcmask (!%p220_p10), 195712   ;;  %s644_s10 = sshll.u32 (!%p220_p10), %s817_s21, 4  ;;  %vm450_vm4 = vcmask (!%p220_p10), 261312   ;;  %vm453_vm5 = vcmask (!%p220_p10), 253952  }
  0x14   : > { %v274_v7 = vunpack.c.0.s8 (!%p220_p10), %v273_v5  ;;  %v431_v50 = vadd.s32 (!%p220_p10), 4294967288, %v426_v48  ;;  %v438_v51 = vadd.s32 (!%p220_p10), 4294967280, %v426_v48  ;;  %v429_v53 = vsub.s32 (!%p220_p10), %v426_v48, %v926_v8  ;;  %s501_s16 = scalar_lea.sflag (!%p220_p10), [#allocation3], %s950_s9  ;;  %s830_s24 = smov (!%p220_p10), [#allocation2]  }
  0x15   : > { %v445_v55 = vadd.s32 (!%p220_p10), 4294967272, %v426_v48  ;;  %s719_s25 = sshll.u32 (!%p220_p10), %s830_s24, 4  ;;  %s720_s25 = int_to_ptr.vmem [resolvable:$false] %s719_s25 }
  0x16   : > { %284 = vperm.xlu0 (!%p220_p10), %714, %v281_v2   ;;  %v277_v9 = vsub.s32 (!%p220_p10), %v274_v7, %v926_v8  ;;  %v434_v54 = vsub.s32 (!%p220_p10), %v431_v50, %v926_v8  ;;  %v441_v56 = vsub.s32 (!%p220_p10), %v438_v51, %v926_v8  ;;  %s721_s27 = scalar_lea.vmem (!%p220_p10), %s720_s25, 32 }
  0x17   : > { %v448_v60 = vsub.s32 (!%p220_p10), %v445_v55, %v926_v8 }
  0x18   : > { %s256_s11 = scalar_select %p255_p11, %s817_s21, 1 }
  0x1a   : > { %s648_s12 = sshll.u32 %s256_s11, 3  ;;  %s247_s11 = scalar_lea.vmem [#allocation2], %s950_s9 }
  0x1b   : > { %s262_s15 = scalar_lea.vmem %s1050_s0, %s648_s12  ;;  %s518_s12 = sshll.u32 %s247_s11, 4  ;;  %s965_s12 = int_to_ptr.vmem [resolvable:$true] %s518_s12 }
  0x1c   : > { %v266_v12 = vld [vmem:[%s262_s15] sm:$0xff]  ;;  %s963_s15 = scalar_lea.hbm %s1054_s4, %s644_s10  ;;  %s715_s17 = scalar_lea.vmem %s965_s12, 16 }
  0x1d   : > { %p716_p12 = scmp.ne.s32.totalorder %s965_s12, %s715_s17  ;;  %p722_p1 = scmp.lt.s32.totalorder %s965_s12, %s720_s25 }
  0x1e   : > { %p723_p2 = scmp.lt.s32.totalorder %s721_s27, %s715_s17 }
  0x1f   : > { %p717_p13 = pnand %p716_p12, %p902_p4 }
  0x20   : > { %p724_p3 = por %p723_p2, %p722_p1 }
  0x21   : > { %p718_p0 = pneg %p717_p13 }
  0x23   : > { %p725_p5 = pnand %p724_p3, %p718_p0 }
  0x91   : > { %v271_v10 = vpop.permute.xlu0 %270 }
  0x92   : > { %v278_v11 = vrot.slane %v271_v10, %v277_v9 }
  0x94   : > { %v280_v14 = vmul.f32 %v278_v11, %v266_v12 }
  0x95   : > { %v285_v13 = vpop.permute.xlu0 %284 }
  0x96   : > { %v292_v15 = vrot.slane %v285_v13, %v277_v9 }
  0x98   : > { %v294_v16 = vadd.f32 %v292_v15, %v280_v14 }
  0x9a   : > { %v295_v17 = vmax.f32 %v294_v16, 0.0 }
  0x9c   : > { %v301_v18 = vcombine.high %v295_v17, %v295_v17 }
  0x9e   : > { %638 = vmatprep.subr.msk.mxu0 %vm315_vm0, %v301_v18  ;;  %649 = vmatprep.subr.msk.mxu1 %vm315_vm0, %v301_v18 }
  0x9f   : > { %639 = vmatpush1.msk.msra.mxu0 %vm315_vm0, %v295_v17  ;;  %650 = vmatpush1.msk.msra.mxu1 %vm315_vm0, %v295_v17 }
  0xa0   : > { %640 = vmatmul.mubr.msk.f32.vlgmr.msra.gmra.mrb[0].mxu0 %vm302_vm1, %v296_v19  ;;  %642 = vmatmul.mubr.msk.f32.vlgmr.msra.gmra.mrb[0].mxu1 %vm302_vm1, %v298_v20 }
  0xa1   : > { %390 = vmatprep.mubr.f32.mxu0 %v828_v3  ;;  %402 = vmatprep.mubr.f32.mxu1 %v828_v3 }
  0xa4   : > { %641 = vmatmul.mubr.msk.f32.gmra.mrb[2].mxu0 %vm302_vm1, %v297_v21  ;;  %643 = vmatmul.mubr.msk.f32.gmra.mrb[2].mxu1 %vm302_vm1, %v299_v22 }
 0x173   : > { %v386_v23 = vpop.f32.mrb[0].mxu0  ;;  %v398_v24 = vpop.f32.mrb[0].mxu1 }
 0x174   : > { %v455_v25 = vmul.f32 %v386_v23, %v386_v23  ;;  %v388_v26 = vpop.f32.mrb[1].mxu0  ;;  %v459_v27 = vmul.f32 %v398_v24, %v398_v24  ;;  %v400_v28 = vpop.f32.mrb[1].mxu1 }
 0x175   : > { %v456_v29 = vmul.f32 %v388_v26, %v388_v26  ;;  %v460_v30 = vmul.f32 %v400_v28, %v400_v28  ;;  %v409_v31 = vadd.f32 %v388_v26, %v386_v23  ;;  %v415_v32 = vadd.f32 %v400_v28, %v398_v24 }
 0x177   : > { %410 = vadd.xlane.f32.xlu1 %v409_v31  ;;  %v463_v33 = vadd.f32 %v456_v29, %v455_v25  ;;  %v392_v34 = vpop.f32.mrb[2].mxu0  ;;  %v469_v35 = vadd.f32 %v460_v30, %v459_v27  ;;  %v404_v36 = vpop.f32.mrb[2].mxu1 }
 0x178   : > { %v457_v37 = vmul.f32 %v392_v34, %v392_v34  ;;  %v394_v38 = vpop.f32.mrb[3].mxu0  ;;  %v461_v39 = vmul.f32 %v404_v36, %v404_v36  ;;  %v406_v40 = vpop.f32.mrb[3].mxu1 }
 0x179   : > { %464 = vadd.xlane.f32.xlu0 %v463_v33  ;;  %v412_v41 = vadd.f32 %v394_v38, %v392_v34  ;;  %v458_v42 = vmul.f32 %v394_v38, %v394_v38  ;;  %v418_v43 = vadd.f32 %v406_v40, %v404_v36  ;;  %v462_v44 = vmul.f32 %v406_v40, %v406_v40 }
 0x17b   : > { %416 = vadd.xlane.f32.xlu1 %v415_v32  ;;  %v466_v45 = vadd.f32 %v458_v42, %v457_v37  ;;  %v472_v46 = vadd.f32 %v462_v44, %v461_v39 }
 0x17f   : > { %470 = vadd.xlane.f32.xlu1 %v469_v35 }
 0x183   : > { %413 = vadd.xlane.f32.xlu1 %v412_v41 }
 0x187   : > { %419 = vadd.xlane.f32.xlu1 %v418_v43 }
 0x18b   : > { %467 = vadd.xlane.f32.xlu1 %v466_v45 }
 0x18f   : > { %473 = vadd.xlane.f32.xlu1 %v472_v46 }
 0x204   : > { %v411_v47 = vpop.xlane.xlu1 %410 }
 0x205   : > { %v430_v58 = vrot.slane %v411_v47, %v429_v53 }
 0x206   : > { %v465_v1 = vpop.xlane.xlu0 %464 }
 0x207   : > { %v482_v5 = vrot.slane %v465_v1, %v429_v53 }
 0x208   : > { %v417_v49 = vpop.xlane.xlu1 %416 }
 0x209   : > { %v442_v62 = vrot.slane %v417_v49, %v441_v56 }
 0x20c   : > { %v945_v52 = vpop.xlane.xlu1 %470 }
 0x210   : > { %v414_v57 = vpop.xlane.xlu1 %413 }
 0x211   : > { %v435_v59 = vrot.slane %v414_v57, %v434_v54 }
 0x213   : > { %v437_v61 = vsel %vm436_vm2, %v435_v59, %v430_v58 }
 0x214   : > { %v420_v63 = vpop.xlane.xlu1 %419  ;;  %v444_v2 = vsel %vm443_vm3, %v442_v62, %v437_v61 }
 0x215   : > { %v449_v0 = vrot.slane %v420_v63, %v448_v60 }
 0x217   : > { %v451_v3 = vsel %vm450_vm4, %v449_v0, %v444_v2 }
 0x218   : > { %v468_v4 = vpop.xlane.xlu1 %467  ;;  %454 = vst.msk [vmem:[%s247_s11] sm:$0x1] %vm453_vm5, %v451_v3 }
 0x219   : > { %v486_v6 = vrot.slane %v468_v4, %v434_v54 }
 0x21a   : > { %728 = shalt.err (!%p725_p5)
}
 0x21b   : > { %s729_s29 = scalar_lea.hbm %s963_s15, 16  ;;  %s733_s11 = scalar_lea.hbm %s1054_s4, 32 }
 0x21c   : > { %p730_p6 = scmp.ne.s32.totalorder %s963_s15, %s729_s29  ;;  %p734_p10 = scmp.lt.u32.totalorder %s963_s15, %s1054_s4 }
 0x21d   : > { %p735_p11 = scmp.lt.u32.totalorder %s733_s11, %s729_s29  ;;  %p737_p13 = scmp.lt.u32.totalorder %s729_s29, %s963_s15 }
 0x21e   : > { %p731_p7 = pnand %p730_p6, %p902_p4 }
 0x21f   : > { %p736_p12 = por %p735_p11, %p734_p10 }
 0x220   : > { %p732_p9 = pneg %p731_p7 }
 0x221   : > { %p738_p0 = por %p737_p13, %p736_p12 }
 0x223   : > { %p739_p1 = pnand %p738_p0, %p732_p9 }
 0x225   : > { %742 = shalt.err (!%p739_p1)
}
 0x226   : > { %651 = dma.vmem_to_hbm [thread:$0]  (%p902_p4), %s965_s12, 16, %s963_s15, %s501_s16   ;;  %v487_v7 = vsel %vm436_vm2, %v486_v6, %v482_v5  ;;  %v491_v8 = vrot.slane %v945_v52, %v441_v56  ;;  %v474_v9 = vpop.xlane.xlu1 %473 }
 0x227   : > { %s253_s17 = scalar_lea.vmem [#allocation4], %s950_s9  ;;  %v496_v10 = vrot.slane %v474_v9, %v448_v60  ;;  %s1000_s29 = scalar_lea.hbm %s1055_s5, %s644_s10 }
 0x228   : > { %s532_s24 = sshll.u32 %s253_s17, 4  ;;  %v492_v11 = vsel %vm443_vm3, %v491_v8, %v487_v7  ;;  %s505_s12 = scalar_lea.sflag [#allocation5], %s950_s9  ;;  %s1002_s24 = int_to_ptr.vmem [resolvable:$true] %s532_s24 }
 0x229   : > { %v497_v12 = vsel %vm450_vm4, %v496_v10, %v492_v11  ;;  %s743_s15 = scalar_lea.vmem %s1002_s24, 16  ;;  %s831_s21 = smov [#allocation4]  }
 0x22a   : > { %499 = vst.msk [vmem:[%s253_s17] sm:$0x1] %vm453_vm5, %v497_v12  ;;  %p744_p2 = scmp.ne.s32.totalorder %s1002_s24, %s743_s15  ;;  %s747_s16 = sshll.u32 %s831_s21, 4  ;;  %s748_s16 = int_to_ptr.vmem [resolvable:$false] %s747_s16 }
 0x22b   : > { %s749_s10 = scalar_lea.vmem %s748_s16, 32  ;;  %p750_p6 = scmp.lt.s32.totalorder %s1002_s24, %s748_s16 }
 0x22c   : > { %p745_p3 = pnand %p744_p2, %p902_p4  ;;  %p751_p7 = scmp.lt.s32.totalorder %s749_s10, %s743_s15 }
 0x22e   : > { %p746_p5 = pneg %p745_p3  ;;  %p752_p9 = por %p751_p7, %p750_p6 }
 0x230   : > { %p753_p10 = pnand %p752_p9, %p746_p5 }
 0x232   : > { %756 = shalt.err (!%p753_p10)
}
 0x233   : > { %s757_s9 = scalar_lea.hbm %s1000_s29, 16  ;;  %s761_s11 = scalar_lea.hbm %s1055_s5, 32 }
 0x234   : > { %p758_p11 = scmp.ne.s32.totalorder %s1000_s29, %s757_s9  ;;  %p762_p0 = scmp.lt.u32.totalorder %s1000_s29, %s1055_s5 }
 0x235   : > { %p763_p1 = scmp.lt.u32.totalorder %s761_s11, %s757_s9  ;;  %p765_p3 = scmp.lt.u32.totalorder %s757_s9, %s1000_s29 }
 0x236   : > { %p759_p12 = pnand %p758_p11, %p902_p4 }
 0x237   : > { %p764_p2 = por %p763_p1, %p762_p0 }
 0x238   : > { %p760_p13 = pneg %p759_p12 }
 0x239   : > { %p766_p5 = por %p765_p3, %p764_p2 }
 0x23b   : > { %p767_p6 = pnand %p766_p5, %p760_p13 }
 0x23d   : > { %770 = shalt.err (!%p767_p6)
}
 0x23e   : > { %652 = dma.vmem_to_hbm [thread:$0]  (%p902_p4), %s1002_s24, 16, %s1000_s29, %s505_s12  }
 0x23f PF: > { %p662_p7 = scmp.ge.s32.totalorder %s825_s23, 2  ;;  %s544_s17 = sand.u32 1, %s805_s18  }
 0x240   : > { %s545_s25 = scalar_lea.sflag [#allocation3], %s544_s17 }
 0x241   : > { %p656_p9 = pnand %p662_p7, %p909_p8 }
 0x243   : > { %796 = dma.done.wait (!%p656_p9), %s545_s25, 16  }
 0x244   : > { %798 = vsyncadd (!%p656_p9), %s545_s25, 4294967280  ;;  %s553_s27 = scalar_lea.sflag [#allocation5], %s544_s17 }
 0x245   : > { %800 = dma.done.wait (!%p656_p9), %s553_s27, 16  }
 0x246   : > { %802 = vsyncadd (!%p656_p9), %s553_s27, 4294967280  ;;  %s22_s23 = sadd.s32 1, %s825_s23   ;;  %s1058_s18 = smov %s809_s19 }
 0x247   : > { %p19_p10 = scmp.ge.s32.totalorder %s22_s23, 4   ;;  %s1059_s19 = smov %s813_s20 }
 0x248   : > { %s1060_s20 = smov %s915_s6  ;;  %s1061_s21 = smov %s821_s22 }
 0x249   : > { %s1062_s22 = smov %s1064_s26  ;;  %21 = sbr.rel (!%p19_p10) target bundleno = 6 (0x6), region = 88 }
 0x250   :  { %557 = vsyncpa [#allocation3], 1 }
 0x251   :  { %559 = vsyncpa [#allocation3 + $0x1], 1 }
 0x252   :  { %560 = vsyncpa [#allocation5], 1 }
 0x253   :  { %562 = vsyncpa [#allocation5 + $0x1], 1 }

</bundles_post_ra>
